<compile_context>
chip_gen: v7x
topology: tpu7x:2x2x1
jax: 0.10.0
libtpu: 0.0.40
codegen_flags: <defaults>
</compile_context>

<pallas_src>
import functools

import jax
import jax.numpy as jnp
import numpy as np
from jax import lax
from jax.experimental import pallas as pl
from jax.experimental.pallas import tpu as pltpu

KSIZE = 2    # kernel_size of both depthwise convs (module default)
STRIDE = 1   # stride of both depthwise convs (module default)
EPS = 1e-5   # BatchNorm2d default eps


def dwsc_fused_kernel(x_ref, wdw1_ref, wpw1_ref, wdw2_ref, wpw2_ref,
                      g_ref, b_ref, mask_ref, o_ref, *, W, HW, K, count, eps):
    """Fused dwconv1 -> pwconv1 -> relu -> dwconv2 -> pwconv2 -> BN -> relu.

    Layouts (all f32):
      x_ref    : (N, Cin,  HW + 2*maxoff)  flattened spatial in lanes, zero-padded
      wdw*_ref : (K*K, C, 1)               per-tap per-channel depthwise weights
      wpw*_ref : (Cin_of_layer, Cout, 1)   pointwise weights, input-channel major
      g/b_ref  : (Cout, 1)                 BN gamma / beta
      mask_ref : (1, 1, HW)                1.0 at valid (h < Ho2, w < Wo2) positions
      o_ref    : (N, Cout, HW)
    """
    maxoff = (K - 1) * W + (K - 1)
    L1 = HW + maxoff                       # width over which stage-1 results are kept

    x = x_ref[...]                         # (N, Cin, HW + 2*maxoff)
    n = x.shape[0]
    cin = x.shape[1]
    cout = o_ref.shape[1]

    def dwconv(a, w_ref, out_len):
        # a: (n, c, >= out_len + maxoff); valid-conv via static lane-offset slices.
        acc = jnp.zeros((a.shape[0], a.shape[1], out_len), jnp.float32)
        t = 0
        for kh in range(K):                # K is tiny -> static unroll (VPU FMAs)
            for kw in range(K):
                off = kh * W + kw
                wt = w_ref[t]              # (c, 1): per-sublane scalar, lane-broadcast
                acc = acc + a[:, :, off:off + out_len] * wt[None, :, :]
                t += 1
        return acc

    # ---- depthwise conv 1 ----------------------------------------------------
    y1 = dwconv(x, wdw1_ref, L1)                              # (n, cin, L1)

    # ---- pointwise conv 1 (+ ReLU): VPU broadcast-FMA over input channels -----
    z1 = jnp.zeros((n, cout, L1), jnp.float32)
    for c in range(cin):
        z1 = z1 + y1[:, c:c + 1, :] * wpw1_ref[c][None, :, :]  # (n,1,L1)*(1,cout,1)
    z1 = jnp.maximum(z1, 0.0)

    # ---- depthwise conv 2 ------------------------------------------------------
    y2 = dwconv(z1, wdw2_ref, HW)                             # (n, cout, HW)

    # ---- pointwise conv 2 ------------------------------------------------------
    z2 = jnp.zeros((n, cout, HW), jnp.float32)
    for c in range(cout):
        z2 = z2 + y2[:, c:c + 1, :] * wpw2_ref[c][None, :, :]

    # ---- BatchNorm (training-mode: batch mean, biased variance) + ReLU --------
    mask = mask_ref[...]                                      # (1, 1, HW)
    inv_count = 1.0 / count
    z2m = z2 * mask
    mean = jnp.sum(jnp.sum(z2m, axis=2, keepdims=True),
                   axis=0, keepdims=True) * inv_count         # (1, cout, 1)
    cent = (z2 - mean) * mask
    var = jnp.sum(jnp.sum(cent * cent, axis=2, keepdims=True),
                  axis=0, keepdims=True) * inv_count          # (1, cout, 1)
    scale = g_ref[...][None, :, :] * lax.rsqrt(var + eps)     # EUP rsqrt
    shift = b_ref[...][None, :, :] - mean * scale
    out = jnp.maximum(z2 * scale + shift, 0.0) * mask         # zero the padded tail
    o_ref[...] = out.astype(o_ref.dtype)


def dwsc_block(x_nchw, w_dw1_pt, w_pw1_pt, w_dw2_pt, w_pw2_pt, gamma, beta,
               eps=EPS):
    """Takes PyTorch-layout tensors (NCHW input, Conv2d weights), returns NCHW."""
    N, Cin, H, W = x_nchw.shape
    Cout = w_pw1_pt.shape[0]
    K = KSIZE
    Ho1, Wo1 = H - (K - 1), W - (K - 1)
    Ho2, Wo2 = Ho1 - (K - 1), Wo1 - (K - 1)
    HW = H * W
    maxoff = (K - 1) * W + (K - 1)

    # ---- layout plumbing (pure XLA, outside the kernel) -----------------------
    x_flat = x_nchw.reshape(N, Cin, HW).astype(jnp.float32)
    x_pad = jnp.pad(x_flat, ((0, 0), (0, 0), (0, 2 * maxoff)))      # (N,Cin,HW+2*maxoff)

    # depthwise (C,1,K,K) -> (K*K, C, 1) ; pointwise (O,I,1,1) -> (I, O, 1)
    wdw1 = jnp.transpose(w_dw1_pt[:, 0], (1, 2, 0)).reshape(K * K, Cin, 1)
    wdw2 = jnp.transpose(w_dw2_pt[:, 0], (1, 2, 0)).reshape(K * K, Cout, 1)
    wpw1 = jnp.transpose(w_pw1_pt[:, :, 0, 0], (1, 0))[:, :, None]  # (Cin, Cout, 1)
    wpw2 = jnp.transpose(w_pw2_pt[:, :, 0, 0], (1, 0))[:, :, None]  # (Cout, Cout, 1)
    g = gamma.reshape(Cout, 1).astype(jnp.float32)
    b = beta.reshape(Cout, 1).astype(jnp.float32)

    hh = jnp.arange(H)[:, None]
    ww = jnp.arange(W)[None, :]
    mask = ((hh < Ho2) & (ww < Wo2)).astype(jnp.float32).reshape(1, 1, HW)

    kernel = functools.partial(dwsc_fused_kernel, W=W, HW=HW, K=K,
                               count=float(N * Ho2 * Wo2), eps=eps)

    out_flat = pl.pallas_call(
        kernel,
        out_shape=jax.ShapeDtypeStruct((N, Cout, HW), jnp.float32),
        grid=(1,),
        in_specs=[
            pl.BlockSpec(x_pad.shape, lambda i: (0, 0, 0)),
            pl.BlockSpec(wdw1.shape, lambda i: (0, 0, 0)),
            pl.BlockSpec(wpw1.shape, lambda i: (0, 0, 0)),
            pl.BlockSpec(wdw2.shape, lambda i: (0, 0, 0)),
            pl.BlockSpec(wpw2.shape, lambda i: (0, 0, 0)),
            pl.BlockSpec(g.shape, lambda i: (0, 0)),
            pl.BlockSpec(b.shape, lambda i: (0, 0)),
            pl.BlockSpec(mask.shape, lambda i: (0, 0, 0)),
        ],
        out_specs=pl.BlockSpec((N, Cout, HW), lambda i: (0, 0, 0)),
        compiler_params=pltpu.CompilerParams(
            dimension_semantics=("arbitrary",)),
    )(x_pad, wdw1, wpw1, wdw2, wpw2, g, b, mask)

    # crop the valid output window (wrapper-side layout plumbing)
    return out_flat.reshape(N, Cout, H, W)[:, :, :Ho2, :Wo2]


# ------------------------- pure-JAX reference (for checking) -------------------
def reference(x_nchw, w_dw1_pt, w_pw1_pt, w_dw2_pt, w_pw2_pt, gamma, beta,
              eps=EPS):
    Cin = x_nchw.shape[1]
    Cout = w_pw1_pt.shape[0]
    dn = ("NCHW", "OIHW", "NCHW")

    def dw(x, w, groups):
        return lax.conv_general_dilated(
            x, w, (STRIDE, STRIDE), "VALID",
            dimension_numbers=dn, feature_group_count=groups)

    def pw(x, w):
        return lax.conv_general_dilated(
            x, w, (1, 1), "VALID", dimension_numbers=dn)

    x = dw(x_nchw, w_dw1_pt, Cin)
    x = jnp.maximum(pw(x, w_pw1_pt), 0.0)
    x = dw(x, w_dw2_pt, Cout)
    x = pw(x, w_pw2_pt)
    mean = jnp.mean(x, axis=(0, 2, 3), keepdims=True)
    var = jnp.var(x, axis=(0, 2, 3), keepdims=True)
    x = (x - mean) / jnp.sqrt(var + eps) * gamma.reshape(1, -1, 1, 1) \
        + beta.reshape(1, -1, 1, 1)
    return jnp.maximum(x, 0.0)


if __name__ == "__main__":
    N, in_ch, H, W = 2, 4, 16, 16
    out_ch = 8

    key = jax.random.PRNGKey(0)
    kx, k1, k2, k3, k4 = jax.random.split(key, 5)

    # PyTorch-style parameter shapes, initialized deterministically.
    x_nchw = jax.random.normal(kx, (N, in_ch, H, W), jnp.float32)
    w_dw1_pt = jax.random.normal(k1, (in_ch, 1, KSIZE, KSIZE), jnp.float32) * 0.5
    w_pw1_pt = jax.random.normal(k2, (out_ch, in_ch, 1, 1), jnp.float32) * 0.5
    w_dw2_pt = jax.random.normal(k3, (out_ch, 1, KSIZE, KSIZE), jnp.float32) * 0.5
    w_pw2_pt = jax.random.normal(k4, (out_ch, out_ch, 1, 1), jnp.float32) * 0.5
    gamma = jnp.ones((out_ch,), jnp.float32)   # BatchNorm2d weight at init
    beta = jnp.zeros((out_ch,), jnp.float32)   # BatchNorm2d bias at init

    out = dwsc_block(x_nchw, w_dw1_pt, w_pw1_pt, w_dw2_pt, w_pw2_pt, gamma, beta)
    out = jax.block_until_ready(out)

    ref = jax.block_until_ready(
        reference(x_nchw, w_dw1_pt, w_pw1_pt, w_dw2_pt, w_pw2_pt, gamma, beta))

    np.testing.assert_allclose(np.asarray(out), np.asarray(ref),
                               rtol=1e-3, atol=1e-4)
    print("KERNEL_OK")
</pallas_src>

<mosaic_0001>
module attributes {stable_mosaic.version = 11 : i64} {
  func.func @dwsc_fused_kernel(%arg0: i32, %arg1: memref<2x4x290xf32, #tpu.memory_space<vmem>>, %arg2: memref<4x4x1xf32, #tpu.memory_space<vmem>>, %arg3: memref<4x8x1xf32, #tpu.memory_space<vmem>>, %arg4: memref<4x8x1xf32, #tpu.memory_space<vmem>>, %arg5: memref<8x8x1xf32, #tpu.memory_space<vmem>>, %arg6: memref<8x1xf32, #tpu.memory_space<vmem>>, %arg7: memref<8x1xf32, #tpu.memory_space<vmem>>, %arg8: memref<1x1x256xf32, #tpu.memory_space<vmem>>, %arg9: memref<2x8x256xf32, #tpu.memory_space<vmem>>) attributes {dimension_semantics = [#tpu.dimension_semantics<arbitrary>], iteration_bounds = array<i64: 1>, scalar_prefetch = 0 : i64, scratch_operands = 0 : i64, tpu.core_type = #tpu.core_type<tc>, window_params = [{pipeline_mode = #tpu.pipeline_mode<synchronous>, transform_indices = @transform_0, window_bounds = array<i64: 2, 4, 290>}, {pipeline_mode = #tpu.pipeline_mode<synchronous>, transform_indices = @transform_1, window_bounds = array<i64: 4, 4, 1>}, {pipeline_mode = #tpu.pipeline_mode<synchronous>, transform_indices = @transform_2, window_bounds = array<i64: 4, 8, 1>}, {pipeline_mode = #tpu.pipeline_mode<synchronous>, transform_indices = @transform_3, window_bounds = array<i64: 4, 8, 1>}, {pipeline_mode = #tpu.pipeline_mode<synchronous>, transform_indices = @transform_4, window_bounds = array<i64: 8, 8, 1>}, {pipeline_mode = #tpu.pipeline_mode<synchronous>, transform_indices = @transform_5, window_bounds = array<i64: 8, 1>}, {pipeline_mode = #tpu.pipeline_mode<synchronous>, transform_indices = @transform_6, window_bounds = array<i64: 8, 1>}, {pipeline_mode = #tpu.pipeline_mode<synchronous>, transform_indices = @transform_7, window_bounds = array<i64: 1, 1, 256>}, {pipeline_mode = #tpu.pipeline_mode<synchronous>, transform_indices = @transform_8, window_bounds = array<i64: 2, 8, 256>}]} {
    %c0 = arith.constant 0 : index
    %c0_0 = arith.constant 0 : index
    %c0_1 = arith.constant 0 : index
    %0 = vector.load %arg1[%c0, %c0_0, %c0_1] : memref<2x4x290xf32, #tpu.memory_space<vmem>>, vector<2x4x290xf32>
    %cst = arith.constant 0.000000e+00 : f32
    %1 = vector.broadcast %cst : f32 to vector<2x4x273xf32>
    %c0_2 = arith.constant 0 : index
    %c0_3 = arith.constant 0 : index
    %c0_4 = arith.constant 0 : index
    %2 = vector.load %arg2[%c0_2, %c0_3, %c0_4] : memref<4x4x1xf32, #tpu.memory_space<vmem>>, vector<1x4x1xf32>
    %3 = vector.shape_cast %2 : vector<1x4x1xf32> to vector<4x1xf32>
    %4 = vector.extract_strided_slice %0 {offsets = [0, 0, 0], sizes = [2, 4, 273], strides = [1, 1, 1]} : vector<2x4x290xf32> to vector<2x4x273xf32>
    %5 = vector.shape_cast %3 : vector<4x1xf32> to vector<1x4x1xf32>
    %6 = vector.broadcast %5 : vector<1x4x1xf32> to vector<2x4x273xf32>
    %7 = arith.mulf %4, %6 : vector<2x4x273xf32>
    %8 = arith.addf %1, %7 : vector<2x4x273xf32>
    %c1 = arith.constant 1 : index
    %c0_5 = arith.constant 0 : index
    %c0_6 = arith.constant 0 : index
    %9 = vector.load %arg2[%c1, %c0_5, %c0_6] : memref<4x4x1xf32, #tpu.memory_space<vmem>>, vector<1x4x1xf32>
    %10 = vector.shape_cast %9 : vector<1x4x1xf32> to vector<4x1xf32>
    %11 = vector.extract_strided_slice %0 {offsets = [0, 0, 1], sizes = [2, 4, 273], strides = [1, 1, 1]} : vector<2x4x290xf32> to vector<2x4x273xf32>
    %12 = vector.shape_cast %10 : vector<4x1xf32> to vector<1x4x1xf32>
    %13 = vector.broadcast %12 : vector<1x4x1xf32> to vector<2x4x273xf32>
    %14 = arith.mulf %11, %13 : vector<2x4x273xf32>
    %15 = arith.addf %8, %14 : vector<2x4x273xf32>
    %c2 = arith.constant 2 : index
    %c0_7 = arith.constant 0 : index
    %c0_8 = arith.constant 0 : index
    %16 = vector.load %arg2[%c2, %c0_7, %c0_8] : memref<4x4x1xf32, #tpu.memory_space<vmem>>, vector<1x4x1xf32>
    %17 = vector.shape_cast %16 : vector<1x4x1xf32> to vector<4x1xf32>
    %18 = vector.extract_strided_slice %0 {offsets = [0, 0, 16], sizes = [2, 4, 273], strides = [1, 1, 1]} : vector<2x4x290xf32> to vector<2x4x273xf32>
    %19 = vector.shape_cast %17 : vector<4x1xf32> to vector<1x4x1xf32>
    %20 = vector.broadcast %19 : vector<1x4x1xf32> to vector<2x4x273xf32>
    %21 = arith.mulf %18, %20 : vector<2x4x273xf32>
    %22 = arith.addf %15, %21 : vector<2x4x273xf32>
    %c3 = arith.constant 3 : index
    %c0_9 = arith.constant 0 : index
    %c0_10 = arith.constant 0 : index
    %23 = vector.load %arg2[%c3, %c0_9, %c0_10] : memref<4x4x1xf32, #tpu.memory_space<vmem>>, vector<1x4x1xf32>
    %24 = vector.shape_cast %23 : vector<1x4x1xf32> to vector<4x1xf32>
    %25 = vector.extract_strided_slice %0 {offsets = [0, 0, 17], sizes = [2, 4, 273], strides = [1, 1, 1]} : vector<2x4x290xf32> to vector<2x4x273xf32>
    %26 = vector.shape_cast %24 : vector<4x1xf32> to vector<1x4x1xf32>
    %27 = vector.broadcast %26 : vector<1x4x1xf32> to vector<2x4x273xf32>
    %28 = arith.mulf %25, %27 : vector<2x4x273xf32>
    %29 = arith.addf %22, %28 : vector<2x4x273xf32>
    %cst_11 = arith.constant 0.000000e+00 : f32
    %30 = vector.broadcast %cst_11 : f32 to vector<2x8x273xf32>
    %31 = vector.extract_strided_slice %29 {offsets = [0, 0, 0], sizes = [2, 1, 273], strides = [1, 1, 1]} : vector<2x4x273xf32> to vector<2x1x273xf32>
    %c0_12 = arith.constant 0 : index
    %c0_13 = arith.constant 0 : index
    %c0_14 = arith.constant 0 : index
    %32 = vector.load %arg3[%c0_12, %c0_13, %c0_14] : memref<4x8x1xf32, #tpu.memory_space<vmem>>, vector<1x8x1xf32>
    %33 = vector.shape_cast %32 : vector<1x8x1xf32> to vector<8x1xf32>
    %34 = vector.shape_cast %33 : vector<8x1xf32> to vector<1x8x1xf32>
    %35 = vector.broadcast %31 : vector<2x1x273xf32> to vector<2x8x273xf32>
    %36 = vector.broadcast %34 : vector<1x8x1xf32> to vector<2x8x273xf32>
    %37 = arith.mulf %35, %36 : vector<2x8x273xf32>
    %38 = arith.addf %30, %37 : vector<2x8x273xf32>
    %39 = vector.extract_strided_slice %29 {offsets = [0, 1, 0], sizes = [2, 1, 273], strides = [1, 1, 1]} : vector<2x4x273xf32> to vector<2x1x273xf32>
    %c1_15 = arith.constant 1 : index
    %c0_16 = arith.constant 0 : index
    %c0_17 = arith.constant 0 : index
    %40 = vector.load %arg3[%c1_15, %c0_16, %c0_17] : memref<4x8x1xf32, #tpu.memory_space<vmem>>, vector<1x8x1xf32>
    %41 = vector.shape_cast %40 : vector<1x8x1xf32> to vector<8x1xf32>
    %42 = vector.shape_cast %41 : vector<8x1xf32> to vector<1x8x1xf32>
    %43 = vector.broadcast %39 : vector<2x1x273xf32> to vector<2x8x273xf32>
    %44 = vector.broadcast %42 : vector<1x8x1xf32> to vector<2x8x273xf32>
    %45 = arith.mulf %43, %44 : vector<2x8x273xf32>
    %46 = arith.addf %38, %45 : vector<2x8x273xf32>
    %47 = vector.extract_strided_slice %29 {offsets = [0, 2, 0], sizes = [2, 1, 273], strides = [1, 1, 1]} : vector<2x4x273xf32> to vector<2x1x273xf32>
    %c2_18 = arith.constant 2 : index
    %c0_19 = arith.constant 0 : index
    %c0_20 = arith.constant 0 : index
    %48 = vector.load %arg3[%c2_18, %c0_19, %c0_20] : memref<4x8x1xf32, #tpu.memory_space<vmem>>, vector<1x8x1xf32>
    %49 = vector.shape_cast %48 : vector<1x8x1xf32> to vector<8x1xf32>
    %50 = vector.shape_cast %49 : vector<8x1xf32> to vector<1x8x1xf32>
    %51 = vector.broadcast %47 : vector<2x1x273xf32> to vector<2x8x273xf32>
    %52 = vector.broadcast %50 : vector<1x8x1xf32> to vector<2x8x273xf32>
    %53 = arith.mulf %51, %52 : vector<2x8x273xf32>
    %54 = arith.addf %46, %53 : vector<2x8x273xf32>
    %55 = vector.extract_strided_slice %29 {offsets = [0, 3, 0], sizes = [2, 1, 273], strides = [1, 1, 1]} : vector<2x4x273xf32> to vector<2x1x273xf32>
    %c3_21 = arith.constant 3 : index
    %c0_22 = arith.constant 0 : index
    %c0_23 = arith.constant 0 : index
    %56 = vector.load %arg3[%c3_21, %c0_22, %c0_23] : memref<4x8x1xf32, #tpu.memory_space<vmem>>, vector<1x8x1xf32>
    %57 = vector.shape_cast %56 : vector<1x8x1xf32> to vector<8x1xf32>
    %58 = vector.shape_cast %57 : vector<8x1xf32> to vector<1x8x1xf32>
    %59 = vector.broadcast %55 : vector<2x1x273xf32> to vector<2x8x273xf32>
    %60 = vector.broadcast %58 : vector<1x8x1xf32> to vector<2x8x273xf32>
    %61 = arith.mulf %59, %60 : vector<2x8x273xf32>
    %62 = arith.addf %54, %61 : vector<2x8x273xf32>
    %cst_24 = arith.constant 0.000000e+00 : f32
    %63 = vector.broadcast %cst_24 : f32 to vector<2x8x273xf32>
    %64 = arith.maximumf %62, %63 : vector<2x8x273xf32>
    %cst_25 = arith.constant 0.000000e+00 : f32
    %65 = vector.broadcast %cst_25 : f32 to vector<2x8x256xf32>
    %c0_26 = arith.constant 0 : index
    %c0_27 = arith.constant 0 : index
    %c0_28 = arith.constant 0 : index
    %66 = vector.load %arg4[%c0_26, %c0_27, %c0_28] : memref<4x8x1xf32, #tpu.memory_space<vmem>>, vector<1x8x1xf32>
    %67 = vector.shape_cast %66 : vector<1x8x1xf32> to vector<8x1xf32>
    %68 = vector.extract_strided_slice %64 {offsets = [0, 0, 0], sizes = [2, 8, 256], strides = [1, 1, 1]} : vector<2x8x273xf32> to vector<2x8x256xf32>
    %69 = vector.shape_cast %67 : vector<8x1xf32> to vector<1x8x1xf32>
    %70 = vector.broadcast %69 : vector<1x8x1xf32> to vector<2x8x256xf32>
    %71 = arith.mulf %68, %70 : vector<2x8x256xf32>
    %72 = arith.addf %65, %71 : vector<2x8x256xf32>
    %c1_29 = arith.constant 1 : index
    %c0_30 = arith.constant 0 : index
    %c0_31 = arith.constant 0 : index
    %73 = vector.load %arg4[%c1_29, %c0_30, %c0_31] : memref<4x8x1xf32, #tpu.memory_space<vmem>>, vector<1x8x1xf32>
    %74 = vector.shape_cast %73 : vector<1x8x1xf32> to vector<8x1xf32>
    %75 = vector.extract_strided_slice %64 {offsets = [0, 0, 1], sizes = [2, 8, 256], strides = [1, 1, 1]} : vector<2x8x273xf32> to vector<2x8x256xf32>
    %76 = vector.shape_cast %74 : vector<8x1xf32> to vector<1x8x1xf32>
    %77 = vector.broadcast %76 : vector<1x8x1xf32> to vector<2x8x256xf32>
    %78 = arith.mulf %75, %77 : vector<2x8x256xf32>
    %79 = arith.addf %72, %78 : vector<2x8x256xf32>
    %c2_32 = arith.constant 2 : index
    %c0_33 = arith.constant 0 : index
    %c0_34 = arith.constant 0 : index
    %80 = vector.load %arg4[%c2_32, %c0_33, %c0_34] : memref<4x8x1xf32, #tpu.memory_space<vmem>>, vector<1x8x1xf32>
    %81 = vector.shape_cast %80 : vector<1x8x1xf32> to vector<8x1xf32>
    %82 = vector.extract_strided_slice %64 {offsets = [0, 0, 16], sizes = [2, 8, 256], strides = [1, 1, 1]} : vector<2x8x273xf32> to vector<2x8x256xf32>
    %83 = vector.shape_cast %81 : vector<8x1xf32> to vector<1x8x1xf32>
    %84 = vector.broadcast %83 : vector<1x8x1xf32> to vector<2x8x256xf32>
    %85 = arith.mulf %82, %84 : vector<2x8x256xf32>
    %86 = arith.addf %79, %85 : vector<2x8x256xf32>
    %c3_35 = arith.constant 3 : index
    %c0_36 = arith.constant 0 : index
    %c0_37 = arith.constant 0 : index
    %87 = vector.load %arg4[%c3_35, %c0_36, %c0_37] : memref<4x8x1xf32, #tpu.memory_space<vmem>>, vector<1x8x1xf32>
    %88 = vector.shape_cast %87 : vector<1x8x1xf32> to vector<8x1xf32>
    %89 = vector.extract_strided_slice %64 {offsets = [0, 0, 17], sizes = [2, 8, 256], strides = [1, 1, 1]} : vector<2x8x273xf32> to vector<2x8x256xf32>
    %90 = vector.shape_cast %88 : vector<8x1xf32> to vector<1x8x1xf32>
    %91 = vector.broadcast %90 : vector<1x8x1xf32> to vector<2x8x256xf32>
    %92 = arith.mulf %89, %91 : vector<2x8x256xf32>
    %93 = arith.addf %86, %92 : vector<2x8x256xf32>
    %cst_38 = arith.constant 0.000000e+00 : f32
    %94 = vector.broadcast %cst_38 : f32 to vector<2x8x256xf32>
    %95 = vector.extract_strided_slice %93 {offsets = [0, 0, 0], sizes = [2, 1, 256], strides = [1, 1, 1]} : vector<2x8x256xf32> to vector<2x1x256xf32>
    %c0_39 = arith.constant 0 : index
    %c0_40 = arith.constant 0 : index
    %c0_41 = arith.constant 0 : index
    %96 = vector.load %arg5[%c0_39, %c0_40, %c0_41] : memref<8x8x1xf32, #tpu.memory_space<vmem>>, vector<1x8x1xf32>
    %97 = vector.shape_cast %96 : vector<1x8x1xf32> to vector<8x1xf32>
    %98 = vector.shape_cast %97 : vector<8x1xf32> to vector<1x8x1xf32>
    %99 = vector.broadcast %95 : vector<2x1x256xf32> to vector<2x8x256xf32>
    %100 = vector.broadcast %98 : vector<1x8x1xf32> to vector<2x8x256xf32>
    %101 = arith.mulf %99, %100 : vector<2x8x256xf32>
    %102 = arith.addf %94, %101 : vector<2x8x256xf32>
    %103 = vector.extract_strided_slice %93 {offsets = [0, 1, 0], sizes = [2, 1, 256], strides = [1, 1, 1]} : vector<2x8x256xf32> to vector<2x1x256xf32>
    %c1_42 = arith.constant 1 : index
    %c0_43 = arith.constant 0 : index
    %c0_44 = arith.constant 0 : index
    %104 = vector.load %arg5[%c1_42, %c0_43, %c0_44] : memref<8x8x1xf32, #tpu.memory_space<vmem>>, vector<1x8x1xf32>
    %105 = vector.shape_cast %104 : vector<1x8x1xf32> to vector<8x1xf32>
    %106 = vector.shape_cast %105 : vector<8x1xf32> to vector<1x8x1xf32>
    %107 = vector.broadcast %103 : vector<2x1x256xf32> to vector<2x8x256xf32>
    %108 = vector.broadcast %106 : vector<1x8x1xf32> to vector<2x8x256xf32>
    %109 = arith.mulf %107, %108 : vector<2x8x256xf32>
    %110 = arith.addf %102, %109 : vector<2x8x256xf32>
    %111 = vector.extract_strided_slice %93 {offsets = [0, 2, 0], sizes = [2, 1, 256], strides = [1, 1, 1]} : vector<2x8x256xf32> to vector<2x1x256xf32>
    %c2_45 = arith.constant 2 : index
    %c0_46 = arith.constant 0 : index
    %c0_47 = arith.constant 0 : index
    %112 = vector.load %arg5[%c2_45, %c0_46, %c0_47] : memref<8x8x1xf32, #tpu.memory_space<vmem>>, vector<1x8x1xf32>
    %113 = vector.shape_cast %112 : vector<1x8x1xf32> to vector<8x1xf32>
    %114 = vector.shape_cast %113 : vector<8x1xf32> to vector<1x8x1xf32>
    %115 = vector.broadcast %111 : vector<2x1x256xf32> to vector<2x8x256xf32>
    %116 = vector.broadcast %114 : vector<1x8x1xf32> to vector<2x8x256xf32>
    %117 = arith.mulf %115, %116 : vector<2x8x256xf32>
    %118 = arith.addf %110, %117 : vector<2x8x256xf32>
    %119 = vector.extract_strided_slice %93 {offsets = [0, 3, 0], sizes = [2, 1, 256], strides = [1, 1, 1]} : vector<2x8x256xf32> to vector<2x1x256xf32>
    %c3_48 = arith.constant 3 : index
    %c0_49 = arith.constant 0 : index
    %c0_50 = arith.constant 0 : index
    %120 = vector.load %arg5[%c3_48, %c0_49, %c0_50] : memref<8x8x1xf32, #tpu.memory_space<vmem>>, vector<1x8x1xf32>
    %121 = vector.shape_cast %120 : vector<1x8x1xf32> to vector<8x1xf32>
    %122 = vector.shape_cast %121 : vector<8x1xf32> to vector<1x8x1xf32>
    %123 = vector.broadcast %119 : vector<2x1x256xf32> to vector<2x8x256xf32>
    %124 = vector.broadcast %122 : vector<1x8x1xf32> to vector<2x8x256xf32>
    %125 = arith.mulf %123, %124 : vector<2x8x256xf32>
    %126 = arith.addf %118, %125 : vector<2x8x256xf32>
    %127 = vector.extract_strided_slice %93 {offsets = [0, 4, 0], sizes = [2, 1, 256], strides = [1, 1, 1]} : vector<2x8x256xf32> to vector<2x1x256xf32>
    %c4 = arith.constant 4 : index
    %c0_51 = arith.constant 0 : index
    %c0_52 = arith.constant 0 : index
    %128 = vector.load %arg5[%c4, %c0_51, %c0_52] : memref<8x8x1xf32, #tpu.memory_space<vmem>>, vector<1x8x1xf32>
    %129 = vector.shape_cast %128 : vector<1x8x1xf32> to vector<8x1xf32>
    %130 = vector.shape_cast %129 : vector<8x1xf32> to vector<1x8x1xf32>
    %131 = vector.broadcast %127 : vector<2x1x256xf32> to vector<2x8x256xf32>
    %132 = vector.broadcast %130 : vector<1x8x1xf32> to vector<2x8x256xf32>
    %133 = arith.mulf %131, %132 : vector<2x8x256xf32>
    %134 = arith.addf %126, %133 : vector<2x8x256xf32>
    %135 = vector.extract_strided_slice %93 {offsets = [0, 5, 0], sizes = [2, 1, 256], strides = [1, 1, 1]} : vector<2x8x256xf32> to vector<2x1x256xf32>
    %c5 = arith.constant 5 : index
    %c0_53 = arith.constant 0 : index
    %c0_54 = arith.constant 0 : index
    %136 = vector.load %arg5[%c5, %c0_53, %c0_54] : memref<8x8x1xf32, #tpu.memory_space<vmem>>, vector<1x8x1xf32>
    %137 = vector.shape_cast %136 : vector<1x8x1xf32> to vector<8x1xf32>
    %138 = vector.shape_cast %137 : vector<8x1xf32> to vector<1x8x1xf32>
    %139 = vector.broadcast %135 : vector<2x1x256xf32> to vector<2x8x256xf32>
    %140 = vector.broadcast %138 : vector<1x8x1xf32> to vector<2x8x256xf32>
    %141 = arith.mulf %139, %140 : vector<2x8x256xf32>
    %142 = arith.addf %134, %141 : vector<2x8x256xf32>
    %143 = vector.extract_strided_slice %93 {offsets = [0, 6, 0], sizes = [2, 1, 256], strides = [1, 1, 1]} : vector<2x8x256xf32> to vector<2x1x256xf32>
    %c6 = arith.constant 6 : index
    %c0_55 = arith.constant 0 : index
    %c0_56 = arith.constant 0 : index
    %144 = vector.load %arg5[%c6, %c0_55, %c0_56] : memref<8x8x1xf32, #tpu.memory_space<vmem>>, vector<1x8x1xf32>
    %145 = vector.shape_cast %144 : vector<1x8x1xf32> to vector<8x1xf32>
    %146 = vector.shape_cast %145 : vector<8x1xf32> to vector<1x8x1xf32>
    %147 = vector.broadcast %143 : vector<2x1x256xf32> to vector<2x8x256xf32>
    %148 = vector.broadcast %146 : vector<1x8x1xf32> to vector<2x8x256xf32>
    %149 = arith.mulf %147, %148 : vector<2x8x256xf32>
    %150 = arith.addf %142, %149 : vector<2x8x256xf32>
    %151 = vector.extract_strided_slice %93 {offsets = [0, 7, 0], sizes = [2, 1, 256], strides = [1, 1, 1]} : vector<2x8x256xf32> to vector<2x1x256xf32>
    %c7 = arith.constant 7 : index
    %c0_57 = arith.constant 0 : index
    %c0_58 = arith.constant 0 : index
    %152 = vector.load %arg5[%c7, %c0_57, %c0_58] : memref<8x8x1xf32, #tpu.memory_space<vmem>>, vector<1x8x1xf32>
    %153 = vector.shape_cast %152 : vector<1x8x1xf32> to vector<8x1xf32>
    %154 = vector.shape_cast %153 : vector<8x1xf32> to vector<1x8x1xf32>
    %155 = vector.broadcast %151 : vector<2x1x256xf32> to vector<2x8x256xf32>
    %156 = vector.broadcast %154 : vector<1x8x1xf32> to vector<2x8x256xf32>
    %157 = arith.mulf %155, %156 : vector<2x8x256xf32>
    %158 = arith.addf %150, %157 : vector<2x8x256xf32>
    %c0_59 = arith.constant 0 : index
    %c0_60 = arith.constant 0 : index
    %c0_61 = arith.constant 0 : index
    %159 = vector.load %arg8[%c0_59, %c0_60, %c0_61] : memref<1x1x256xf32, #tpu.memory_space<vmem>>, vector<1x1x256xf32>
    %160 = vector.broadcast %159 : vector<1x1x256xf32> to vector<2x8x256xf32>
    %161 = arith.mulf %158, %160 : vector<2x8x256xf32>
    %cst_62 = arith.constant dense<0.000000e+00> : vector<2x8xf32>
    %162 = vector.multi_reduction <add>, %161, %cst_62 [2] : vector<2x8x256xf32> to vector<2x8xf32>
    %163 = vector.shape_cast %162 : vector<2x8xf32> to vector<2x8x1xf32>
    %cst_63 = arith.constant dense<0.000000e+00> : vector<8x1xf32>
    %164 = vector.multi_reduction <add>, %163, %cst_63 [0] : vector<2x8x1xf32> to vector<8x1xf32>
    %165 = vector.shape_cast %164 : vector<8x1xf32> to vector<1x8x1xf32>
    %cst_64 = arith.constant 0.00255102036 : f32
    %166 = vector.broadcast %cst_64 : f32 to vector<1x8x1xf32>
    %167 = arith.mulf %165, %166 : vector<1x8x1xf32>
    %168 = vector.broadcast %167 : vector<1x8x1xf32> to vector<2x8x256xf32>
    %169 = arith.subf %158, %168 : vector<2x8x256xf32>
    %170 = vector.broadcast %159 : vector<1x1x256xf32> to vector<2x8x256xf32>
    %171 = arith.mulf %169, %170 : vector<2x8x256xf32>
    %172 = arith.mulf %171, %171 : vector<2x8x256xf32>
    %cst_65 = arith.constant dense<0.000000e+00> : vector<2x8xf32>
    %173 = vector.multi_reduction <add>, %172, %cst_65 [2] : vector<2x8x256xf32> to vector<2x8xf32>
    %174 = vector.shape_cast %173 : vector<2x8xf32> to vector<2x8x1xf32>
    %cst_66 = arith.constant dense<0.000000e+00> : vector<8x1xf32>
    %175 = vector.multi_reduction <add>, %174, %cst_66 [0] : vector<2x8x1xf32> to vector<8x1xf32>
    %176 = vector.shape_cast %175 : vector<8x1xf32> to vector<1x8x1xf32>
    %cst_67 = arith.constant 0.00255102036 : f32
    %177 = vector.broadcast %cst_67 : f32 to vector<1x8x1xf32>
    %178 = arith.mulf %176, %177 : vector<1x8x1xf32>
    %c0_68 = arith.constant 0 : index
    %c0_69 = arith.constant 0 : index
    %179 = vector.load %arg6[%c0_68, %c0_69] : memref<8x1xf32, #tpu.memory_space<vmem>>, vector<8x1xf32>
    %180 = vector.shape_cast %179 : vector<8x1xf32> to vector<1x8x1xf32>
    %cst_70 = arith.constant 9.99999974E-6 : f32
    %181 = vector.broadcast %cst_70 : f32 to vector<1x8x1xf32>
    %182 = arith.addf %178, %181 : vector<1x8x1xf32>
    %183 = math.rsqrt %182 : vector<1x8x1xf32>
    %184 = arith.mulf %180, %183 : vector<1x8x1xf32>
    %c0_71 = arith.constant 0 : index
    %c0_72 = arith.constant 0 : index
    %185 = vector.load %arg7[%c0_71, %c0_72] : memref<8x1xf32, #tpu.memory_space<vmem>>, vector<8x1xf32>
    %186 = vector.shape_cast %185 : vector<8x1xf32> to vector<1x8x1xf32>
    %187 = arith.mulf %167, %184 : vector<1x8x1xf32>
    %188 = arith.subf %186, %187 : vector<1x8x1xf32>
    %189 = vector.broadcast %184 : vector<1x8x1xf32> to vector<2x8x256xf32>
    %190 = arith.mulf %158, %189 : vector<2x8x256xf32>
    %191 = vector.broadcast %188 : vector<1x8x1xf32> to vector<2x8x256xf32>
    %192 = arith.addf %190, %191 : vector<2x8x256xf32>
    %cst_73 = arith.constant 0.000000e+00 : f32
    %193 = vector.broadcast %cst_73 : f32 to vector<2x8x256xf32>
    %194 = arith.maximumf %192, %193 : vector<2x8x256xf32>
    %195 = vector.broadcast %159 : vector<1x1x256xf32> to vector<2x8x256xf32>
    %196 = arith.mulf %194, %195 : vector<2x8x256xf32>
    %c0_74 = arith.constant 0 : index
    %c0_75 = arith.constant 0 : index
    %c0_76 = arith.constant 0 : index
    %197 = vector.load %arg9[%c0_74, %c0_75, %c0_76] : memref<2x8x256xf32, #tpu.memory_space<vmem>>, vector<2x8x256xf32>
    tpu.vector_store %arg9[%c0_74, %c0_75, %c0_76], %196 {strides = array<i32>} : memref<2x8x256xf32, #tpu.memory_space<vmem>>, vector<2x8x256xf32>,
    return
  }
  func.func @transform_0(%arg0: i32) -> (i32, i32, i32) {
    %c0_i32 = arith.constant 0 : i32
    %c0_i32_0 = arith.constant 0 : i32
    %c0_i32_1 = arith.constant 0 : i32
    %c0_i32_2 = arith.constant 0 : i32
    return %c0_i32, %c0_i32_0, %c0_i32_1 : i32, i32, i32
  }
  func.func @transform_1(%arg0: i32) -> (i32, i32, i32) {
    %c0_i32 = arith.constant 0 : i32
    %c0_i32_0 = arith.constant 0 : i32
    %c0_i32_1 = arith.constant 0 : i32
    %c0_i32_2 = arith.constant 0 : i32
    return %c0_i32, %c0_i32_0, %c0_i32_1 : i32, i32, i32
  }
  func.func @transform_2(%arg0: i32) -> (i32, i32, i32) {
    %c0_i32 = arith.constant 0 : i32
    %c0_i32_0 = arith.constant 0 : i32
    %c0_i32_1 = arith.constant 0 : i32
    %c0_i32_2 = arith.constant 0 : i32
    return %c0_i32, %c0_i32_0, %c0_i32_1 : i32, i32, i32
  }
  func.func @transform_3(%arg0: i32) -> (i32, i32, i32) {
    %c0_i32 = arith.constant 0 : i32
    %c0_i32_0 = arith.constant 0 : i32
    %c0_i32_1 = arith.constant 0 : i32
    %c0_i32_2 = arith.constant 0 : i32
    return %c0_i32, %c0_i32_0, %c0_i32_1 : i32, i32, i32
  }
  func.func @transform_4(%arg0: i32) -> (i32, i32, i32) {
    %c0_i32 = arith.constant 0 : i32
    %c0_i32_0 = arith.constant 0 : i32
    %c0_i32_1 = arith.constant 0 : i32
    %c0_i32_2 = arith.constant 0 : i32
    return %c0_i32, %c0_i32_0, %c0_i32_1 : i32, i32, i32
  }
  func.func @transform_5(%arg0: i32) -> (i32, i32) {
    %c0_i32 = arith.constant 0 : i32
    %c0_i32_0 = arith.constant 0 : i32
    %c0_i32_1 = arith.constant 0 : i32
    return %c0_i32, %c0_i32_0 : i32, i32
  }
  func.func @transform_6(%arg0: i32) -> (i32, i32) {
    %c0_i32 = arith.constant 0 : i32
    %c0_i32_0 = arith.constant 0 : i32
    %c0_i32_1 = arith.constant 0 : i32
    return %c0_i32, %c0_i32_0 : i32, i32
  }
  func.func @transform_7(%arg0: i32) -> (i32, i32, i32) {
    %c0_i32 = arith.constant 0 : i32
    %c0_i32_0 = arith.constant 0 : i32
    %c0_i32_1 = arith.constant 0 : i32
    %c0_i32_2 = arith.constant 0 : i32
    return %c0_i32, %c0_i32_0, %c0_i32_1 : i32, i32, i32
  }
  func.func @transform_8(%arg0: i32) -> (i32, i32, i32) {
    %c0_i32 = arith.constant 0 : i32
    %c0_i32_0 = arith.constant 0 : i32
    %c0_i32_1 = arith.constant 0 : i32
    %c0_i32_2 = arith.constant 0 : i32
    return %c0_i32, %c0_i32_0, %c0_i32_1 : i32, i32, i32
  }
}

</mosaic_0001>

<bundles_post_ra>
// kernel: tpu_custom_call.1
= control target key start
LH: loop header
LB: loop body
LE: loop exit
PB: predicated region body
PF: predicated region fallthrough
CT: control target
= control target key end

     0   :  { %v1037_v1 = vmov 0   ;;  %s1480_s0 = inlined_call_operand.vmem [shape: f32[2,4,290], index: 0, kind: input, shape index: {}]   ;;  %s1481_s1 = inlined_call_operand.vmem [shape: f32[4,4,1], index: 1, kind: input, shape index: {}]   ;;  %s1482_s2 = inlined_call_operand.vmem [shape: f32[4,8,1], index: 2, kind: input, shape index: {}]   ;;  %s1483_s3 = inlined_call_operand.vmem [shape: f32[4,8,1], index: 3, kind: input, shape index: {}]   ;;  %s1484_s4 = inlined_call_operand.vmem [shape: f32[8,8,1], index: 4, kind: input, shape index: {}]   ;;  %s1485_s5 = inlined_call_operand.vmem [shape: f32[8,1], index: 5, kind: input, shape index: {}]   ;;  %s1486_s6 = inlined_call_operand.vmem [shape: f32[8,1], index: 6, kind: input, shape index: {}]   ;;  %s1487_s7 = inlined_call_operand.vmem [shape: f32[1,1,256], index: 7, kind: input, shape index: {}]   ;;  %s1488_s8 = inlined_call_operand.hbm [shape: f32[2,8,256], index: 8, kind: output, shape index: {}]  }
   0x1   :  { %v985_v0 = vld [vmem:[%s1481_s1 + $0x4] sm:$0xf]  ;;  %1009 = vset.pattern.permute.xlu0 %v1037_v1  ;;  %1010 = vset.pattern.permute.xlu1 %v1037_v1  ;;  %v987_v2 = vld [vmem:[%s1481_s1 + $0xc] sm:$0xf] }
   0x2   :  { %59 = vperm.xlu0 %1009, %v985_v0   ;;  %154 = vperm.xlu1 %1010, %v987_v2  }
   0x3   :  { %13 = vsyncpa [#allocation3], 0  ;;  %v986_v3 = vld [vmem:[%s1481_s1 + $0x8] sm:$0xf]  ;;  %v34_v4 = vld [vmem:[%s1481_s1] sm:$0xf]  ;;  %v42_v7 = vlaneseq }
   0x4   :  { %v1038_v5 = vmov 839922192   ;;  %v31_v12 = vld [vmem:[%s1480_s0 + $0x8] sm:$0xf]  ;;  %v30_v13 = vld [vmem:[%s1480_s0] sm:$0xff]  ;;  %v32_v20 = vld [vmem:[%s1480_s0 + $0xc] sm:$0xff] }
   0x5   :  { %v40_v6 = vunpack.c.l.s4 %v1038_v5  ;;  %v1102_v9 = vshrl.u32 %v42_v7, 7  ;;  %v33_v19 = vld [vmem:[%s1480_s0 + $0x14] sm:$0xf]  ;;  %s1039_s20 = smov 127   ;;  %s1040_s0 = smov 112   ;;  %v988_v39 = vld [vmem:[%s1482_s2 + $0x8] sm:$0xff] }
   0x6   :  { %107 = vperm.xlu0 %1009, %v986_v3   ;;  %37 = vperm.xlu1 %1010, %v34_v4   ;;  %s1041_s21 = smov 111   ;;  %v197_v40 = vld [vmem:[%s1482_s2] sm:$0xff]  ;;  %v990_v41 = vld [vmem:[%s1482_s2 + $0x18] sm:$0xff]  ;;  %v989_v42 = vld [vmem:[%s1482_s2 + $0x10] sm:$0xff]  ;;  %vm89_vm0 = vcmask 1043456   ;;  %vm91_vm1 = vcmask 1039360  }
   0x7   :  { %v41_v8 = vunpack.c.0.s8 %v40_v6  ;;  %v992_v43 = vld [vmem:[%s1483_s3 + $0x10] sm:$0xff]  ;;  %v991_v44 = vld [vmem:[%s1483_s3 + $0x8] sm:$0xff]  ;;  %v498_v45 = vld [vmem:[%s1483_s3] sm:$0xff]  ;;  %vm138_vm2 = vcmask 916480   ;;  %vm185_vm3 = vcmask 908288  }
   0x8   :  { %v993_v46 = vld [vmem:[%s1483_s3 + $0x18] sm:$0xff]  ;;  %v994_v47 = vld [vmem:[%s1484_s4 + $0x8] sm:$0xff]  ;;  %v641_v48 = vld [vmem:[%s1484_s4] sm:$0xff] }
   0x9   :  { %v44_v10 = vsub.s32 %v41_v8, %v1102_v9  ;;  %v995_v49 = vld [vmem:[%s1484_s4 + $0x10] sm:$0xff] }
  0x81   :  { %v60_v11 = vpop.permute.xlu0 %59  ;;  %v155_v14 = vpop.permute.xlu1 %154 }
  0x82   :  { %v67_v15 = vrot.slane %v60_v11, %v44_v10  ;;  %v162_v32 = vrot.slane %v155_v14, %v44_v10 }
  0x84   :  { %v70_v16 = vmul.f32 %v67_v15, %v31_v12  ;;  %v69_v17 = vmul.f32 %v67_v15, %v30_v13  ;;  %v72_v24 = vmul.f32 %v67_v15, %v33_v19  ;;  %v71_v25 = vmul.f32 %v67_v15, %v32_v20 }
  0x85   :  { %v108_v18 = vpop.permute.xlu0 %107  ;;  %v38_v21 = vpop.permute.xlu1 %37  ;;  %v165_v35 = vmul.f32 %v162_v32, %v31_v12  ;;  %v164_v36 = vmul.f32 %v162_v32, %v30_v13  ;;  %v167_v37 = vmul.f32 %v162_v32, %v33_v19  ;;  %v166_v38 = vmul.f32 %v162_v32, %v32_v20 }
  0x86   :  { %79 = vrot.lane.b32.xlu1 %v70_v16, %s1039_s20  ;;  %77 = vrot.lane.b32.xlu0 %v69_v17, %s1039_s20  ;;  %v45_v22 = vrot.slane %v38_v21, %v44_v10  ;;  %v115_v23 = vrot.slane %v108_v18, %v44_v10  ;;  %v1182_v21 = vsub.s32 1, %v1102_v9 }
  0x88   :  { %v1119_v26 = vmul.f32 %v45_v22, %v31_v12  ;;  %v1121_v27 = vmul.f32 %v45_v22, %v30_v13  ;;  %v1123_v28 = vmul.f32 %v45_v22, %v33_v19  ;;  %v1125_v29 = vmul.f32 %v45_v22, %v32_v20 }
  0x89   :  { %v118_v30 = vmul.f32 %v115_v23, %v31_v12  ;;  %v117_v31 = vmul.f32 %v115_v23, %v30_v13  ;;  %v120_v33 = vmul.f32 %v115_v23, %v33_v19  ;;  %v119_v34 = vmul.f32 %v115_v23, %v32_v20 }
  0x8a   :  { %83 = vrot.lane.b32.xlu1 %v72_v24, %s1039_s20  ;;  %81 = vrot.lane.b32.xlu0 %v71_v25, %s1039_s20  ;;  %v1179_v20 = vsub.s32 0, %v1102_v9  ;;  %v1186_v24 = vsub.s32 2, %v1102_v9 }
  0x8e   :  { %127 = vrot.lane.b32.xlu1 %v118_v30, %s1040_s0  ;;  %125 = vrot.lane.b32.xlu0 %v117_v31, %s1040_s0  ;;  %v1191_v30 = vsub.s32 3, %v1102_v9 }
  0x92   :  { %131 = vrot.lane.b32.xlu1 %v120_v33, %s1040_s0  ;;  %129 = vrot.lane.b32.xlu0 %v119_v34, %s1040_s0 }
  0x96   :  { %174 = vrot.lane.b32.xlu1 %v165_v35, %s1041_s21  ;;  %172 = vrot.lane.b32.xlu0 %v164_v36, %s1041_s21  ;;  %v1199_v36 = vsub.s32 5, %v1102_v9 }
  0x9a   :  { %178 = vrot.lane.b32.xlu1 %v167_v37, %s1041_s21  ;;  %176 = vrot.lane.b32.xlu0 %v166_v38, %s1041_s21 }
  0x9e   :  { %331 = vperm.xlu1 %1010, %v988_v39   ;;  %258 = vperm.xlu0 %1009, %v197_v40   ;;  %v1205_v40 = vsub.s32 4, %v1102_v9 }
  0xa2   :  { %477 = vperm.xlu1 %1010, %v990_v41   ;;  %404 = vperm.xlu0 %1009, %v989_v42  }
  0xa6   :  { %559 = vperm.xlu1 %1010, %v992_v43   ;;  %516 = vperm.xlu0 %1009, %v991_v44  }
  0xaa   :  { %501 = vperm.xlu1 %1010, %v498_v45   ;;  %602 = vperm.xlu0 %1009, %v993_v46  }
  0xae   :  { %691 = vperm.xlu1 %1010, %v994_v47   ;;  %660 = vperm.xlu0 %1009, %v641_v48  }
  0xb2   :  { %722 = vperm.xlu0 %1009, %v995_v49  }
  0xf8   :  { %v80_v50 = vpop.permute.xlu1 %79  ;;  %v78_v51 = vpop.permute.xlu0 %77 }
  0xf9   :  { %v86_v58 = vrot.slane %v80_v50, 4  ;;  %v85_v59 = vrot.slane %v78_v51, 4  ;;  %v100_v8 = vadd.f32 %v80_v50, %v1119_v26 }
  0xfb   :  { %v90_v0 = vsel %vm89_vm0, %v85_v59, %v86_v58 }
  0xfc   :  { %v84_v52 = vpop.permute.xlu1 %83  ;;  %v82_v53 = vpop.permute.xlu0 %81  ;;  %v92_v10 = vsel %vm91_vm1, %v78_v51, %v90_v0 }
  0xfd   :  { %v88_v1 = vrot.slane %v84_v52, 4  ;;  %v87_v2 = vrot.slane %v82_v53, 4  ;;  %v102_v13 = vadd.f32 %v84_v52, %v1123_v28  ;;  %v99_v22 = vadd.f32 %v92_v10, %v1121_v27 }
  0xff   :  { %v93_v14 = vsel %vm89_vm0, %v87_v2, %v88_v1 }
 0x100   :  { %v128_v54 = vpop.permute.xlu1 %127  ;;  %v126_v55 = vpop.permute.xlu0 %125  ;;  %v94_v31 = vsel %vm91_vm1, %v82_v53, %v93_v14 }
 0x101   :  { %v134_v62 = vrot.slane %v128_v54, 4  ;;  %v133_v63 = vrot.slane %v126_v55, 4  ;;  %v147_v16 = vadd.f32 %v128_v54, %v100_v8  ;;  %v101_v37 = vadd.f32 %v94_v31, %v1125_v29 }
 0x102   :  { %v1226_v54 = vsub.s32 7, %v1102_v9 }
 0x103   :  { %v137_v5 = vsel %vm89_vm0, %v133_v63, %v134_v62 }
 0x104   :  { %v132_v56 = vpop.permute.xlu1 %131  ;;  %v130_v57 = vpop.permute.xlu0 %129  ;;  %v139_v17 = vsel %vm138_vm2, %v126_v55, %v137_v5  ;;  %v1229_v55 = vsub.s32 6, %v1102_v9 }
 0x105   :  { %v136_v11 = vrot.slane %v132_v56, 4  ;;  %v135_v12 = vrot.slane %v130_v57, 4  ;;  %v149_v23 = vadd.f32 %v132_v56, %v102_v13  ;;  %v146_v32 = vadd.f32 %v139_v17, %v99_v22 }
 0x107   :  { %v140_v25 = vsel %vm89_vm0, %v135_v12, %v136_v11 }
 0x108   :  { %v175_v60 = vpop.permute.xlu1 %174  ;;  %v173_v61 = vpop.permute.xlu0 %172  ;;  %v141_v27 = vsel %vm138_vm2, %v130_v57, %v140_v25 }
 0x109   :  { %v181_v3 = vrot.slane %v175_v60, 4  ;;  %v180_v4 = vrot.slane %v173_v61, 4  ;;  %v194_v26 = vadd.f32 %v175_v60, %v147_v16  ;;  %v148_v45 = vadd.f32 %v141_v27, %v101_v37 }
 0x10b   :  { %v184_v15 = vsel %vm89_vm0, %v180_v4, %v181_v3  ;;  %v213_v38 = vrot.slane %v194_v26, %v1179_v20  ;;  %v286_v39 = vrot.slane %v194_v26, %v1182_v21  ;;  %v359_v41 = vrot.slane %v194_v26, %v1186_v24 }
 0x10c   :  { %v179_v6 = vpop.permute.xlu1 %178  ;;  %v177_v7 = vpop.permute.xlu0 %176  ;;  %v186_v28 = vsel %vm185_vm3, %v173_v61, %v184_v15  ;;  %v432_v42 = vrot.slane %v194_v26, %v1191_v30 }
 0x10d   :  { %v183_v18 = vrot.slane %v179_v6, 4  ;;  %v182_v19 = vrot.slane %v177_v7, 4  ;;  %v196_v33 = vadd.f32 %v179_v6, %v149_v23  ;;  %v1196_v35 = vadd.f32 %v186_v28, %v146_v32 }
 0x10e   :  { %v243_v51 = vrot.slane %v213_v38, %v1179_v20  ;;  %v316_v56 = vrot.slane %v286_v39, %v1182_v21  ;;  %v389_v57 = vrot.slane %v359_v41, %v1186_v24  ;;  %v462_v58 = vrot.slane %v432_v42, %v1191_v30 }
 0x10f   :  { %v187_v34 = vsel %vm89_vm0, %v182_v19, %v183_v18  ;;  %v225_v43 = vrot.slane %v196_v33, %v1179_v20  ;;  %v298_v46 = vrot.slane %v196_v33, %v1182_v21  ;;  %v371_v29 = vrot.slane %v196_v33, %v1186_v24 }
 0x110   :  { %v188_v44 = vsel %vm185_vm3, %v177_v7, %v187_v34  ;;  %v444_v47 = vrot.slane %v196_v33, %v1191_v30  ;;  %v278_v48 = vrot.slane %v1196_v35, %v1182_v21  ;;  %v282_v49 = vrot.slane %v1196_v35, %v1199_v36 }
 0x111   :  { %v205_v50 = vrot.slane %v1196_v35, %v1179_v20  ;;  %v1221_v52 = vadd.f32 %v188_v44, %v148_v45  ;;  %v255_v59 = vrot.slane %v225_v43, %v1179_v20  ;;  %v328_v61 = vrot.slane %v298_v46, %v1182_v21 }
 0x112   :  { %v401_v62 = vrot.slane %v371_v29, %v1186_v24  ;;  %v474_v63 = vrot.slane %v444_v47, %v1191_v30  ;;  %v209_v0 = vrot.slane %v1196_v35, %v1205_v40  ;;  %v308_v9 = vrot.slane %v278_v48, %v1182_v21 }
 0x113   :  { %v312_v1 = vrot.slane %v282_v49, %v1182_v21  ;;  %v235_v2 = vrot.slane %v205_v50, %v1179_v20  ;;  %v424_v3 = vrot.slane %v1196_v35, %v1191_v30  ;;  %v290_v4 = vrot.slane %v1221_v52, %v1182_v21 }
 0x114   :  { %v294_v5 = vrot.slane %v1221_v52, %v1199_v36  ;;  %v351_v12 = vrot.slane %v1196_v35, %v1186_v24  ;;  %v355_v13 = vrot.slane %v1196_v35, %v1229_v55  ;;  %v217_v14 = vrot.slane %v1221_v52, %v1179_v20 }
 0x115   :  { %v221_v15 = vrot.slane %v1221_v52, %v1205_v40  ;;  %v239_v16 = vrot.slane %v209_v0, %v1179_v20  ;;  %v428_v17 = vrot.slane %v1196_v35, %v1226_v54  ;;  %v436_v19 = vrot.slane %v1221_v52, %v1191_v30 }
 0x116   :  { %v440_v22 = vrot.slane %v1221_v52, %v1226_v54  ;;  %v320_v26 = vrot.slane %v290_v4, %v1182_v21  ;;  %v324_v28 = vrot.slane %v294_v5, %v1182_v21  ;;  %v363_v31 = vrot.slane %v1221_v52, %v1186_v24 }
 0x117   :  { %v367_v33 = vrot.slane %v1221_v52, %v1229_v55  ;;  %v381_v34 = vrot.slane %v351_v12, %v1186_v24  ;;  %v385_v27 = vrot.slane %v355_v13, %v1186_v24  ;;  %v247_v46 = vrot.slane %v217_v14, %v1179_v20 }
 0x118   :  { %v251_v29 = vrot.slane %v221_v15, %v1179_v20  ;;  %v393_v49 = vrot.slane %v363_v31, %v1186_v24  ;;  %v466_v15 = vrot.slane %v436_v19, %v1191_v30 }
 0x119   :  { %v397_v50 = vrot.slane %v367_v33, %v1186_v24 }
 0x11d   :  { %v1223_v53 = vpop.permute.xlu0 %258  ;;  %v332_v60 = vpop.permute.xlu1 %331 }
 0x11e   :  { %v339_v6 = vmul.f32 %v332_v60, %v328_v61  ;;  %v266_v7 = vmul.f32 %v1223_v53, %v255_v59  ;;  %v336_v10 = vmul.f32 %v332_v60, %v316_v56  ;;  %v263_v11 = vmul.f32 %v1223_v53, %v243_v51 }
 0x11f   :  { %v335_v37 = vmul.f32 %v332_v60, %v312_v1  ;;  %v262_v38 = vmul.f32 %v1223_v53, %v239_v16  ;;  %v334_v42 = vmul.f32 %v332_v60, %v308_v9  ;;  %v261_v43 = vmul.f32 %v1223_v53, %v235_v2 }
 0x120   :  { %v345_v32 = vadd.f32 %v339_v6, %v266_v7  ;;  %v342_v35 = vadd.f32 %v336_v10, %v263_v11  ;;  %v337_v56 = vmul.f32 %v332_v60, %v320_v26  ;;  %v458_v1 = vrot.slane %v428_v17, %v1191_v30 }
 0x121   :  { %v405_v8 = vpop.permute.xlu0 %404  ;;  %v1262_v18 = vpop.permute.xlu1 %477  ;;  %v341_v59 = vadd.f32 %v335_v37, %v262_v38  ;;  %v454_v6 = vrot.slane %v424_v3, %v1191_v30  ;;  %v470_v3 = vrot.slane %v440_v22, %v1191_v30 }
 0x122   :  { %v409_v23 = vmul.f32 %v405_v8, %v389_v57  ;;  %v412_v25 = vmul.f32 %v405_v8, %v401_v62  ;;  %v485_v41 = vmul.f32 %v1262_v18, %v474_v63  ;;  %v482_v45 = vmul.f32 %v1262_v18, %v462_v58 }
 0x123   :  { %v408_v47 = vmul.f32 %v405_v8, %v385_v27  ;;  %v407_v51 = vmul.f32 %v405_v8, %v381_v34  ;;  %v264_v57 = vmul.f32 %v1223_v53, %v247_v46  ;;  %v338_v62 = vmul.f32 %v332_v60, %v324_v28 }
 0x124   :  { %v418_v39 = vadd.f32 %v412_v25, %v345_v32  ;;  %v415_v44 = vadd.f32 %v409_v23, %v342_v35  ;;  %v265_v58 = vmul.f32 %v1223_v53, %v251_v29  ;;  %v340_v63 = vadd.f32 %v334_v42, %v261_v43 }
 0x125   :  { %v517_v0 = vpop.permute.xlu0 %516  ;;  %v410_v2 = vmul.f32 %v405_v8, %v393_v49  ;;  %v414_v4 = vadd.f32 %v408_v47, %v341_v59  ;;  %v411_v7 = vmul.f32 %v405_v8, %v397_v50  ;;  %v343_v12 = vadd.f32 %v337_v56, %v264_v57  ;;  %v560_v14 = vpop.permute.xlu1 %559  ;;  %v996_v50 = vld [vmem:[%s1484_s4 + $0x18] sm:$0xff]  ;;  %v999_v56 = vld [vmem:[%s1484_s4 + $0x30] sm:$0xff] }
 0x126   :  { %v491_v48 = vadd.f32 %v485_v41, %v418_v39  ;;  %v488_v52 = vadd.f32 %v482_v45, %v415_v44  ;;  %v413_v10 = vadd.f32 %v407_v51, %v340_v63  ;;  %v481_v13 = vmul.f32 %v1262_v18, %v458_v1  ;;  %v997_v51 = vld [vmem:[%s1484_s4 + $0x20] sm:$0xff]  ;;  %v1000_v57 = vld [vmem:[%s1484_s4 + $0x38] sm:$0xff] }
 0x127   :  { %v344_v60 = vadd.f32 %v338_v62, %v265_v58  ;;  %v480_v53 = vmul.f32 %v1262_v18, %v454_v6  ;;  %v416_v16 = vadd.f32 %v410_v2, %v343_v12  ;;  %v483_v31 = vmul.f32 %v1262_v18, %v466_v15 }
 0x128   :  { %v497_v61 = vmax.f32 %v491_v48, 0.0  ;;  %v494_v9 = vmax.f32 %v488_v52, 0.0  ;;  %v487_v23 = vadd.f32 %v481_v13, %v414_v4  ;;  %v484_v32 = vmul.f32 %v1262_v18, %v470_v3  ;;  %v998_v52 = vld [vmem:[%s1484_s4 + $0x28] sm:$0xff] }
 0x129   :  { %v417_v8 = vadd.f32 %v411_v7, %v344_v60  ;;  %v603_v25 = vpop.permute.xlu0 %602  ;;  %v486_v28 = vadd.f32 %v480_v53, %v413_v10  ;;  %v489_v19 = vadd.f32 %v483_v31, %v416_v16  ;;  %v502_v59 = vpop.permute.xlu1 %501 }
 0x12a   :  { %v524_v5 = vmul.f32 %v517_v0, %v497_v61  ;;  %v521_v11 = vmul.f32 %v517_v0, %v494_v9  ;;  %v567_v17 = vmul.f32 %v560_v14, %v497_v61  ;;  %v564_v26 = vmul.f32 %v560_v14, %v494_v9 }
 0x12b   :  { %v610_v33 = vmul.f32 %v603_v25, %v497_v61  ;;  %v493_v34 = vmax.f32 %v487_v23, 0.0  ;;  %v607_v27 = vmul.f32 %v603_v25, %v494_v9  ;;  %v492_v35 = vmax.f32 %v486_v28, 0.0 }
 0x12c   :  { %541 = vrot.lane.b32.xlu1 %v524_v5, %s1039_s20  ;;  %535 = vrot.lane.b32.xlu0 %v521_v11, %s1039_s20  ;;  %v490_v37 = vadd.f32 %v484_v32, %v417_v8  ;;  %v1300_v38 = vmax.f32 %v489_v19, 0.0 }
 0x12d   :  { %v520_v22 = vmul.f32 %v517_v0, %v493_v34  ;;  %v519_v39 = vmul.f32 %v517_v0, %v492_v35  ;;  %v563_v43 = vmul.f32 %v560_v14, %v493_v34  ;;  %v562_v44 = vmul.f32 %v560_v14, %v492_v35  ;;  %v1337_v61 = vpop.permute.xlu0 %660  ;;  %v1339_v62 = vpop.permute.xlu1 %691 }
 0x12e   :  { %v1302_v41 = vmax.f32 %v490_v37, 0.0  ;;  %v522_v18 = vmul.f32 %v517_v0, %v1300_v38  ;;  %v565_v45 = vmul.f32 %v560_v14, %v1300_v38  ;;  %v606_v29 = vmul.f32 %v603_v25, %v493_v34 }
 0x12f   :  { %v605_v47 = vmul.f32 %v603_v25, %v492_v35  ;;  %v608_v48 = vmul.f32 %v603_v25, %v1300_v38  ;;  %v505_v60 = vmul.f32 %v502_v59, %v493_v34  ;;  %v504_v15 = vmul.f32 %v502_v59, %v492_v35 }
 0x130   :  { %584 = vrot.lane.b32.xlu1 %v567_v17, %s1040_s0  ;;  %578 = vrot.lane.b32.xlu0 %v564_v26, %s1040_s0  ;;  %v523_v42 = vmul.f32 %v517_v0, %v1302_v41  ;;  %v566_v46 = vmul.f32 %v560_v14, %v1302_v41  ;;  %v609_v49 = vmul.f32 %v603_v25, %v1302_v41 }
 0x131   :  { %v1341_v58 = vpop.permute.xlu0 %722  ;;  %v506_v32 = vmul.f32 %v502_v59, %v1300_v38 }
 0x134   :  { %627 = vrot.lane.b32.xlu1 %v610_v33, %s1041_s21  ;;  %621 = vrot.lane.b32.xlu0 %v607_v27, %s1041_s21  ;;  %v507_v33 = vmul.f32 %v502_v59, %v1302_v41 }
 0x138   :  { %533 = vrot.lane.b32.xlu1 %v520_v22, %s1039_s20  ;;  %531 = vrot.lane.b32.xlu0 %v519_v39, %s1039_s20 }
 0x13c   :  { %537 = vrot.lane.b32.xlu1 %v522_v18, %s1039_s20  ;;  %539 = vrot.lane.b32.xlu0 %v523_v42, %s1039_s20 }
 0x140   :  { %576 = vrot.lane.b32.xlu1 %v563_v43, %s1040_s0  ;;  %574 = vrot.lane.b32.xlu0 %v562_v44, %s1040_s0 }
 0x144   :  { %580 = vrot.lane.b32.xlu1 %v565_v45, %s1040_s0  ;;  %582 = vrot.lane.b32.xlu0 %v566_v46, %s1040_s0 }
 0x148   :  { %619 = vrot.lane.b32.xlu1 %v606_v29, %s1041_s21  ;;  %617 = vrot.lane.b32.xlu0 %v605_v47, %s1041_s21 }
 0x14c   :  { %623 = vrot.lane.b32.xlu1 %v608_v48, %s1041_s21  ;;  %625 = vrot.lane.b32.xlu0 %v609_v49, %s1041_s21 }
 0x150   :  { %753 = vperm.xlu1 %1010, %v996_v50   ;;  %784 = vperm.xlu0 %1009, %v997_v51  }
 0x154   :  { %815 = vperm.xlu1 %1010, %v998_v52   ;;  %846 = vperm.xlu0 %1009, %v999_v56  }
 0x158   :  { %877 = vperm.xlu1 %1010, %v1000_v57  }
 0x19e   :  { %v542_v63 = vpop.permute.xlu1 %541  ;;  %v536_v0 = vpop.permute.xlu0 %535 }
 0x1a2   :  { %v585_v9 = vpop.permute.xlu1 %584  ;;  %v579_v1 = vpop.permute.xlu0 %578 }
 0x1a6   :  { %v628_v2 = vpop.permute.xlu1 %627  ;;  %v622_v4 = vpop.permute.xlu0 %621 }
 0x1aa   :  { %v534_v5 = vpop.permute.xlu1 %533  ;;  %v532_v6 = vpop.permute.xlu0 %531 }
 0x1ab   :  { %v544_v13 = vsel %vm91_vm1, %v534_v5, %v536_v0  ;;  %v543_v53 = vsel %vm91_vm1, %v532_v6, %v534_v5 }
 0x1ac   :  { %v552_v23 = vadd.f32 %v544_v13, %v505_v60  ;;  %v551_v8 = vadd.f32 %v543_v53, %v504_v15 }
 0x1ae   :  { %v538_v7 = vpop.permute.xlu1 %537  ;;  %v540_v10 = vpop.permute.xlu0 %539 }
 0x1af   :  { %v545_v25 = vsel %vm91_vm1, %v538_v7, %v540_v10  ;;  %v546_v26 = vsel %vm91_vm1, %v540_v10, %v542_v63 }
 0x1b0   :  { %v553_v18 = vadd.f32 %v545_v25, %v506_v32  ;;  %v554_v42 = vadd.f32 %v546_v26, %v507_v33 }
 0x1b2   :  { %v577_v11 = vpop.permute.xlu1 %576  ;;  %v575_v12 = vpop.permute.xlu0 %574 }
 0x1b3   :  { %v587_v16 = vsel %vm138_vm2, %v577_v11, %v579_v1  ;;  %v586_v3 = vsel %vm138_vm2, %v575_v12, %v577_v11  ;;  %v888_v12 = vld [vmem:[%s1487_s7] sm:$0x3] }
 0x1b4   :  { %v595_v28 = vadd.f32 %v587_v16, %v552_v23  ;;  %v594_v34 = vadd.f32 %v586_v3, %v551_v8  ;;  %v1404_v16 = vrot.slane %v888_v12, %v1179_v20 }
 0x1b6   :  { %v581_v14 = vpop.permute.xlu1 %580  ;;  %v583_v17 = vpop.permute.xlu0 %582 }
 0x1b7   :  { %v588_v35 = vsel %vm138_vm2, %v581_v14, %v583_v17  ;;  %v589_v37 = vsel %vm138_vm2, %v583_v17, %v585_v9 }
 0x1b8   :  { %v596_v45 = vadd.f32 %v588_v35, %v553_v18  ;;  %v597_v46 = vadd.f32 %v589_v37, %v554_v42 }
 0x1ba   :  { %v620_v31 = vpop.permute.xlu1 %619  ;;  %v618_v27 = vpop.permute.xlu0 %617 }
 0x1bb   :  { %v630_v19 = vsel %vm185_vm3, %v620_v31, %v622_v4  ;;  %v629_v39 = vsel %vm185_vm3, %v618_v27, %v620_v31 }
 0x1bc   :  { %v1354_v22 = vadd.f32 %v630_v19, %v595_v28  ;;  %v1357_v43 = vadd.f32 %v629_v39, %v594_v34 }
 0x1be   :  { %v624_v44 = vpop.permute.xlu1 %623  ;;  %v649_v38 = vrot.slane %v1354_v22, %v1179_v20  ;;  %v680_v41 = vrot.slane %v1354_v22, %v1182_v21  ;;  %v626_v29 = vpop.permute.xlu0 %625  ;;  %v645_v49 = vrot.slane %v1357_v43, %v1179_v20  ;;  %v676_v50 = vrot.slane %v1357_v43, %v1182_v21 }
 0x1bf   :  { %v631_v47 = vsel %vm185_vm3, %v624_v44, %v626_v29  ;;  %v632_v48 = vsel %vm185_vm3, %v626_v29, %v628_v2  ;;  %v707_v4 = vrot.slane %v1357_v43, %v1186_v24  ;;  %v711_v5 = vrot.slane %v1354_v22, %v1186_v24 }
 0x1c0   :  { %v1369_v51 = vadd.f32 %v631_v47, %v596_v45  ;;  %v1371_v52 = vadd.f32 %v632_v48, %v597_v46  ;;  %v664_v56 = vmul.f32 %v1337_v61, %v649_v38  ;;  %v695_v57 = vmul.f32 %v1339_v62, %v680_v41 }
 0x1c1   :  { %v663_v1 = vmul.f32 %v1337_v61, %v645_v49  ;;  %v694_v2 = vmul.f32 %v1339_v62, %v676_v50  ;;  %v726_v15 = vmul.f32 %v1341_v58, %v711_v5  ;;  %v725_v3 = vmul.f32 %v1341_v58, %v707_v4 }
 0x1c2   :  { %v653_v59 = vrot.slane %v1369_v51, %v1179_v20  ;;  %v657_v63 = vrot.slane %v1371_v52, %v1179_v20  ;;  %v684_v0 = vrot.slane %v1369_v51, %v1182_v21  ;;  %v688_v9 = vrot.slane %v1371_v52, %v1182_v21 }
 0x1c3   :  { %v699_v13 = vadd.f32 %v695_v57, %v664_v56  ;;  %v715_v60 = vrot.slane %v1369_v51, %v1186_v24  ;;  %v719_v53 = vrot.slane %v1371_v52, %v1186_v24  ;;  %v698_v14 = vadd.f32 %v694_v2, %v663_v1 }
 0x1c4   :  { %v665_v6 = vmul.f32 %v1337_v61, %v653_v59  ;;  %v666_v7 = vmul.f32 %v1337_v61, %v657_v63  ;;  %v696_v10 = vmul.f32 %v1339_v62, %v684_v0  ;;  %v697_v11 = vmul.f32 %v1339_v62, %v688_v9 }
 0x1c5   :  { %v742_v61 = vrot.slane %v1354_v22, %v1191_v30  ;;  %v1407_v62 = vrot.slane %v888_v12, %v1182_v21  ;;  %v738_v8 = vrot.slane %v1357_v43, %v1191_v30  ;;  %v727_v24 = vmul.f32 %v1341_v58, %v715_v60 }
 0x1c6   :  { %v700_v17 = vadd.f32 %v696_v10, %v665_v6  ;;  %v701_v23 = vadd.f32 %v697_v11, %v666_v7  ;;  %v728_v25 = vmul.f32 %v1341_v58, %v719_v53  ;;  %v730_v26 = vadd.f32 %v726_v15, %v699_v13 }
 0x1c7   :  { %v773_v28 = vrot.slane %v1354_v22, %v1205_v40  ;;  %v729_v20 = vadd.f32 %v725_v3, %v698_v14  ;;  %v746_v21 = vrot.slane %v1369_v51, %v1191_v30  ;;  %v750_v31 = vrot.slane %v1371_v52, %v1191_v30 }
 0x1c8   :  { %v777_v32 = vrot.slane %v1369_v51, %v1205_v40  ;;  %v781_v33 = vrot.slane %v1371_v52, %v1205_v40  ;;  %v769_v58 = vrot.slane %v1357_v43, %v1205_v40  ;;  %v800_v34 = vrot.slane %v1357_v43, %v1199_v36 }
 0x1c9   :  { %v804_v19 = vrot.slane %v1354_v22, %v1199_v36  ;;  %v731_v27 = vadd.f32 %v727_v24, %v700_v17  ;;  %v732_v35 = vadd.f32 %v728_v25, %v701_v23  ;;  %v808_v30 = vrot.slane %v1369_v51, %v1199_v36 }
 0x1ca   :  { %v812_v37 = vrot.slane %v1371_v52, %v1199_v36  ;;  %v835_v18 = vrot.slane %v1354_v22, %v1229_v55  ;;  %v839_v40 = vrot.slane %v1369_v51, %v1229_v55  ;;  %v843_v42 = vrot.slane %v1371_v52, %v1229_v55 }
 0x1cb   :  { %v831_v44 = vrot.slane %v1357_v43, %v1229_v55  ;;  %v862_v0 = vrot.slane %v1357_v43, %v1226_v54  ;;  %v866_v55 = vrot.slane %v1354_v22, %v1226_v54  ;;  %v870_v9 = vrot.slane %v1369_v51, %v1226_v54 }
 0x1cc   :  { %v874_v1 = vrot.slane %v1371_v52, %v1226_v54 }
 0x1cf   :  { %v754_v39 = vpop.permute.xlu1 %753  ;;  %v785_v29 = vpop.permute.xlu0 %784 }
 0x1d0   :  { %v756_v38 = vmul.f32 %v754_v39, %v738_v8  ;;  %v757_v41 = vmul.f32 %v754_v39, %v742_v61  ;;  %v758_v45 = vmul.f32 %v754_v39, %v746_v21  ;;  %v759_v46 = vmul.f32 %v754_v39, %v750_v31 }
 0x1d1   :  { %v787_v47 = vmul.f32 %v785_v29, %v769_v58  ;;  %v788_v36 = vmul.f32 %v785_v29, %v773_v28  ;;  %v789_v48 = vmul.f32 %v785_v29, %v777_v32  ;;  %v790_v49 = vmul.f32 %v785_v29, %v781_v33 }
 0x1d2   :  { %v760_v50 = vadd.f32 %v756_v38, %v729_v20  ;;  %v761_v56 = vadd.f32 %v757_v41, %v730_v26  ;;  %v762_v57 = vadd.f32 %v758_v45, %v731_v27  ;;  %v763_v59 = vadd.f32 %v759_v46, %v732_v35 }
 0x1d3   :  { %v816_v63 = vpop.permute.xlu1 %815  ;;  %v847_v7 = vpop.permute.xlu0 %846 }
 0x1d4   :  { %v791_v2 = vadd.f32 %v787_v47, %v760_v50  ;;  %v792_v4 = vadd.f32 %v788_v36, %v761_v56  ;;  %v793_v5 = vadd.f32 %v789_v48, %v762_v57  ;;  %v794_v6 = vadd.f32 %v790_v49, %v763_v59 }
 0x1d5   :  { %v818_v10 = vmul.f32 %v816_v63, %v800_v34  ;;  %v819_v11 = vmul.f32 %v816_v63, %v804_v19  ;;  %v820_v12 = vmul.f32 %v816_v63, %v808_v30  ;;  %v821_v13 = vmul.f32 %v816_v63, %v812_v37 }
 0x1d6   :  { %v849_v60 = vmul.f32 %v847_v7, %v831_v44  ;;  %v850_v43 = vmul.f32 %v847_v7, %v835_v18  ;;  %v851_v53 = vmul.f32 %v847_v7, %v839_v40  ;;  %v852_v14 = vmul.f32 %v847_v7, %v843_v42 }
 0x1d7   :  { %v822_v22 = vadd.f32 %v818_v10, %v791_v2  ;;  %v823_v15 = vadd.f32 %v819_v11, %v792_v4  ;;  %v824_v61 = vadd.f32 %v820_v12, %v793_v5  ;;  %v825_v51 = vadd.f32 %v821_v13, %v794_v6  ;;  %v878_v17 = vpop.permute.xlu1 %877  ;;  %v936_v2 = vld [vmem:[%s1486_s6] sm:$0xff] }
 0x1d8   :  { %v880_v23 = vmul.f32 %v878_v17, %v862_v0  ;;  %v881_v54 = vmul.f32 %v878_v17, %v866_v55  ;;  %v882_v52 = vmul.f32 %v878_v17, %v870_v9  ;;  %v883_v3 = vmul.f32 %v878_v17, %v874_v1  ;;  %v932_v55 = vld [vmem:[%s1485_s5] sm:$0xff]  ;;  %s1042_s5 = smov [#allocation2]  }
 0x1d9   :  { %v853_v8 = vadd.f32 %v849_v60, %v822_v22  ;;  %v854_v24 = vadd.f32 %v850_v43, %v823_v15  ;;  %v855_v25 = vadd.f32 %v851_v53, %v824_v61  ;;  %v856_v26 = vadd.f32 %v852_v14, %v825_v51  ;;  %s974_s10 = sshll.u32 %s1042_s5, 4  ;;  %s975_s10 = int_to_ptr.vmem [resolvable:$true] %s974_s10 }
 0x1da   :  { %s1013_s6 = scalar_lea.vmem %s975_s10, 512  ;;  %p1018_p1 = scmp.lt.s32.totalorder %s975_s10, %s975_s10 }
 0x1db   :  { %v884_v28 = vadd.f32 %v880_v23, %v853_v8  ;;  %v885_v20 = vadd.f32 %v881_v54, %v854_v24  ;;  %v886_v21 = vadd.f32 %v882_v52, %v855_v25  ;;  %v887_v31 = vadd.f32 %v883_v3, %v856_v26  ;;  %p1014_p0 = scmp.ne.s32.totalorder %s975_s10, %s1013_s6  ;;  %p1019_p2 = scmp.lt.s32.totalorder %s1013_s6, %s1013_s6 }
 0x1dd   :  { %v902_v32 = vmul.f32 %v1404_v16, %v886_v21  ;;  %v903_v33 = vmul.f32 %v1407_v62, %v887_v31  ;;  %v900_v58 = vmul.f32 %v1404_v16, %v884_v28  ;;  %v901_v34 = vmul.f32 %v1407_v62, %v885_v20  ;;  %p1020_p3 = por %p1019_p2, %p1018_p1 }
 0x1df   :  { %v907_v19 = vadd.f32 %v903_v33, %v902_v32  ;;  %v904_v27 = vadd.f32 %v901_v34, %v900_v58  ;;  %p1021_p4 = pnand %p1020_p3, %p1014_p0 }
 0x1e1   :  { %908 = vadd.xlane.f32.xlu1 %v907_v19  ;;  %905 = vadd.xlane.f32.xlu0 %v904_v27 }
 0x26e   :  { %v909_v35 = vpop.xlane.xlu1 %908  ;;  %v906_v30 = vpop.xlane.xlu0 %905 }
 0x26f   :  { %v910_v37 = vadd.f32 %v909_v35, %v906_v30 }
 0x271   :  { %v911_v39 = vmul.f32 0.0025510204, %v910_v37 }
 0x273   :  { %v912_v18 = vsub.f32 %v884_v28, %v911_v39  ;;  %v913_v40 = vsub.f32 %v885_v20, %v911_v39  ;;  %v914_v42 = vsub.f32 %v886_v21, %v911_v39  ;;  %v915_v44 = vsub.f32 %v887_v31, %v911_v39 }
 0x275   :  { %v916_v38 = vmul.f32 %v912_v18, %v1404_v16  ;;  %v917_v41 = vmul.f32 %v913_v40, %v1407_v62  ;;  %v918_v45 = vmul.f32 %v914_v42, %v1404_v16  ;;  %v919_v46 = vmul.f32 %v915_v44, %v1407_v62 }
 0x277   :  { %v920_v29 = vmul.f32 %v916_v38, %v916_v38  ;;  %v921_v47 = vmul.f32 %v917_v41, %v917_v41  ;;  %v922_v48 = vmul.f32 %v918_v45, %v918_v45  ;;  %v923_v49 = vmul.f32 %v919_v46, %v919_v46 }
 0x279   :  { %v924_v36 = vadd.f32 %v921_v47, %v920_v29  ;;  %v927_v50 = vadd.f32 %v923_v49, %v922_v48 }
 0x27b   :  { %925 = vadd.xlane.f32.xlu0 %v924_v36 }
 0x27f   :  { %928 = vadd.xlane.f32.xlu0 %v927_v50 }
 0x308   :  { %v926_v56 = vpop.xlane.xlu0 %925 }
 0x30c   :  { %v929_v57 = vpop.xlane.xlu0 %928 }
 0x30d   :  { %v930_v59 = vadd.f32 %v929_v57, %v926_v56 }
 0x30f   :  { %v931_v63 = vmul.f32 0.0025510204, %v930_v59 }
 0x311   :  { %v933_v0 = vadd.f32 1e-05, %v931_v63 }
 0x313   :  { %1011 = vrsqrt.f32 %v933_v0 }
 0x31d   :  { %v1012_v9 = vpop.eup %1011 }
 0x31e   :  { %v935_v1 = vmul.f32 %v1012_v9, %v932_v55 }
 0x320   :  { %941 = vperm.xlu1 %1010, %v935_v1   ;;  %v937_v4 = vmul.f32 %v935_v1, %v911_v39 }
 0x322   :  { %v938_v5 = vsub.f32 %v936_v2, %v937_v4 }
 0x324   :  { %950 = vperm.xlu0 %1009, %v938_v5  }
 0x39f   :  { %v942_v6 = vpop.permute.xlu1 %941 }
 0x3a0   :  { %v944_v7 = vmul.f32 %v942_v6, %v884_v28  ;;  %v945_v10 = vmul.f32 %v942_v6, %v885_v20  ;;  %v946_v11 = vmul.f32 %v942_v6, %v886_v21  ;;  %v947_v12 = vmul.f32 %v942_v6, %v887_v31 }
 0x3a3   :  { %v951_v13 = vpop.permute.xlu0 %950 }
 0x3a4   :  { %v953_v60 = vadd.f32 %v951_v13, %v944_v7  ;;  %v954_v43 = vadd.f32 %v951_v13, %v945_v10  ;;  %v955_v53 = vadd.f32 %v951_v13, %v946_v11  ;;  %v956_v14 = vadd.f32 %v951_v13, %v947_v12 }
 0x3a6   :  { %v957_v22 = vmax.f32 %v953_v60, 0.0  ;;  %v958_v15 = vmax.f32 %v954_v43, 0.0  ;;  %v959_v61 = vmax.f32 %v955_v53, 0.0  ;;  %v960_v51 = vmax.f32 %v956_v14, 0.0 }
 0x3a8   :  { %v961_v17 = vmul.f32 %v957_v22, %v1404_v16  ;;  %v962_v23 = vmul.f32 %v958_v15, %v1407_v62  ;;  %v963_v54 = vmul.f32 %v959_v61, %v1404_v16  ;;  %v964_v52 = vmul.f32 %v960_v51, %v1407_v62 }
 0x3aa   :  { %965 = vst [vmem:[#allocation2] sm:$0xff] %v961_v17  ;;  %966 = vst [vmem:[#allocation2 + $0x8] sm:$0xff] %v962_v23 }
 0x3ab   :  { %967 = vst [vmem:[#allocation2 + $0x10] sm:$0xff] %v963_v54  ;;  %968 = vst [vmem:[#allocation2 + $0x18] sm:$0xff] %v964_v52 }
 0x3ac   :  { %1024 = shalt.err (!%p1021_p4)
}
 0x3ad   :  { %s1025_s13 = scalar_lea.hbm %s1488_s8, 512 }
 0x3ae   :  { %p1026_p5 = scmp.ne.s32.totalorder %s1488_s8, %s1025_s13  ;;  %p1029_p6 = scmp.lt.u32.totalorder %s1025_s13, %s1488_s8 }
 0x3b0   :  { %p1031_p7 = pnand %p1029_p6, %p1026_p5 }
 0x3b2   :  { %1034 = shalt.err (!%p1031_p7)
}
 0x3b3   :  { %s1043_s1 = smov 256   ;;  %s1044_s17 = smov 16  }
 0x3b4   :  { %980 = dma.vmem_to_hbm [thread:$0]  %s975_s10, 512, %s1488_s8, [#allocation3], %s1043_s1, %s1043_s1, %s1044_s17  }
 0x3b5   :  { %1035 = dma.done.wait [#allocation3], 512  }
 0x3b6   :  { %1036 = vsyncadd [#allocation3], 4294966784 }
 0x3b7   :  { %984 = vsyncpa [#allocation3], 1 }

</bundles_post_ra>
